<compile_context>
chip_gen: v6e
topology: v6e:2x2x1
jax: 0.10.0
libtpu: 0.0.40
codegen_flags: <defaults>
</compile_context>

<pallas_src>
import functools

import jax
import jax.numpy as jnp
from jax.experimental import pallas as pl
from jax.experimental.pallas import tpu as pltpu


def _round_up(a, b):
    return ((a + b - 1) // b) * b


def frn_tlu_kernel(eps_ref, x_ref, gamma_ref, beta_ref, tau_ref, o_ref, *, inv_hw):
    # x_ref / o_ref          : (row_tile, HW_pad) tile of the (NC_pad, HW_pad) slab.
    # gamma/beta/tau_ref     : (row_tile, 1) per-row params (same row tiling as x).
    # eps_ref                : (1,) f32 scalar in SMEM.
    x = x_ref[...]
    xf = x.astype(jnp.float32)

    # Padded lanes are zero, so the lane-sum over the padded axis equals the sum over
    # the true H*W; divide by the TRUE H*W (compile-time constant inv_hw).
    nu2 = jnp.sum(xf * xf, axis=-1, keepdims=True) * inv_hw     # XLU lane reduce
    inv = jax.lax.rsqrt(nu2 + jnp.abs(eps_ref[0]))              # EUP rsqrt

    g = gamma_ref[...]
    b = beta_ref[...]
    t = tau_ref[...]

    if x.dtype == jnp.float32:
        y = jnp.maximum(g * (xf * inv) + b, t)
    else:
        # Sub-32-bit I/O (e.g. bf16): fold gamma*rsqrt into one per-row scale, then
        # keep the wide elementwise path in the I/O dtype.
        scale = (g * inv).astype(x.dtype)
        y = jnp.maximum(x * scale + b.astype(x.dtype), t.astype(x.dtype))
    o_ref[...] = y.astype(o_ref.dtype)


def frn_tlu(x, gamma, beta, tau, eps, *, target_block_bytes=2 * 1024 * 1024,
            max_row_tile=1024):
    """FRN + TLU matching PyTorch FRN_TLU.forward.

    x: (N, C, H, W). gamma/beta/tau: (C,). eps: scalar (learnable, abs() applied).
    """
    N, C, H, W = x.shape
    NC, HW = N * C, H * W
    itemsize = jnp.dtype(x.dtype).itemsize

    # Lane-dense last axis: pad H*W up to a multiple of 128.
    HW_pad = _round_up(max(HW, 128), 128)

    # Dtype-aware sublane multiple (f32: 8, bf16: 16, int8/fp8: 32).
    sub = {4: 8, 2: 16, 1: 32}.get(itemsize, 8)

    # Largest row tile that keeps double-buffered in+out blocks in budget, does not
    # over-pad a small N*C, and is a sublane multiple.
    rows_fit = max(sub, target_block_bytes // (HW_pad * itemsize))
    row_tile = min(rows_fit, max_row_tile, _round_up(NC, sub))
    row_tile = max(sub, (row_tile // sub) * sub)

    NC_pad = _round_up(NC, row_tile)
    grid = NC_pad // row_tile

    # Pad x into a lane-dense (NC_pad, HW_pad) slab (zeros are benign, see kernel).
    x2 = x.reshape(NC, HW)
    if NC_pad != NC or HW_pad != HW:
        x2 = jnp.pad(x2, ((0, NC_pad - NC), (0, HW_pad - HW)))

    def per_row(p):
        p = jnp.broadcast_to(p.reshape(1, C), (N, C)).reshape(NC, 1)
        if NC_pad != NC:
            p = jnp.pad(p, ((0, NC_pad - NC), (0, 0)))
        return p.astype(jnp.float32)

    g, b, t = per_row(gamma), per_row(beta), per_row(tau)
    eps_arr = jnp.asarray(eps, jnp.float32).reshape(1)

    kernel = functools.partial(frn_tlu_kernel, inv_hw=1.0 / float(HW))

    # Rough VMEM need: double-buffered x + out tiles, plus tiled per-row params
    # (each (row_tile,1) f32 pads to (row_tile,128) lanes in VMEM), plus headroom.
    block_bytes = row_tile * HW_pad * itemsize
    param_bytes = 3 * 2 * row_tile * 128 * 4
    vmem_need = 4 * block_bytes + param_bytes + (1 << 20)
    ckwargs = dict(dimension_semantics=("parallel",))
    if vmem_need > 12 * 1024 * 1024:
        # Only needed when a huge H*W forces big minimum blocks (e.g. on v5e's 16 MiB
        # default scoped VMEM). Capped below v7x's 64 MiB physical VMEM.
        ckwargs["vmem_limit_bytes"] = int(min(vmem_need, 60 * 1024 * 1024))

    out = pl.pallas_call(
        kernel,
        out_shape=jax.ShapeDtypeStruct((NC_pad, HW_pad), x.dtype),
        grid_spec=pltpu.PrefetchScalarGridSpec(
            num_scalar_prefetch=0,
            grid=(grid,),
            in_specs=[
                pl.BlockSpec(memory_space=pltpu.MemorySpace.SMEM),    # eps (scalar)
                pl.BlockSpec((row_tile, HW_pad), lambda i: (i, 0)),   # x rows
                pl.BlockSpec((row_tile, 1), lambda i: (i, 0)),        # gamma rows
                pl.BlockSpec((row_tile, 1), lambda i: (i, 0)),        # beta rows
                pl.BlockSpec((row_tile, 1), lambda i: (i, 0)),        # tau rows
            ],
            out_specs=pl.BlockSpec((row_tile, HW_pad), lambda i: (i, 0)),
        ),
        compiler_params=pltpu.CompilerParams(**ckwargs),
    )(eps_arr, x2, g, b, t)

    return out[:NC, :HW].reshape(N, C, H, W)


def frn_tlu_ref(x, gamma, beta, tau, eps):
    # Pure-JAX reference matching the PyTorch module.
    nu2 = jnp.mean(x * x, axis=(2, 3), keepdims=True)
    xn = x * jax.lax.rsqrt(nu2 + jnp.abs(eps))
    y = gamma.reshape(1, -1, 1, 1) * xn + beta.reshape(1, -1, 1, 1)
    return jnp.maximum(y, tau.reshape(1, -1, 1, 1))


if __name__ == "__main__":
    N, C, H, W = 2, 4, 16, 16
    key = jax.random.PRNGKey(0)
    kx, kg, kb, kt = jax.random.split(key, 4)

    x = jax.random.normal(kx, (N, C, H, W), dtype=jnp.float32)
    # Module init: gamma=1, beta=0, tau=0, eps learnable init 1e-6 — perturbed
    # slightly so every term is exercised.
    gamma = 1.0 + 0.1 * jax.random.normal(kg, (C,), dtype=jnp.float32)
    beta = 0.1 * jax.random.normal(kb, (C,), dtype=jnp.float32)
    tau = 0.1 * jax.random.normal(kt, (C,), dtype=jnp.float32)
    eps = jnp.float32(1e-6)

    out = jax.block_until_ready(frn_tlu(x, gamma, beta, tau, eps))
    ref = frn_tlu_ref(x, gamma, beta, tau, eps)
    assert out.shape == (N, C, H, W)
    assert jnp.allclose(out, ref, atol=1e-5, rtol=1e-5)

    # Also exercise a shape that needs both N*C padding and H*W lane padding.
    x3 = jax.random.normal(kx, (2, 3, 7, 7), dtype=jnp.float32)
    g3 = 1.0 + 0.1 * jax.random.normal(kg, (3,), dtype=jnp.float32)
    b3 = 0.1 * jax.random.normal(kb, (3,), dtype=jnp.float32)
    t3 = 0.1 * jax.random.normal(kt, (3,), dtype=jnp.float32)
    out3 = jax.block_until_ready(frn_tlu(x3, g3, b3, t3, eps))
    ref3 = frn_tlu_ref(x3, g3, b3, t3, eps)
    assert jnp.allclose(out3, ref3, atol=1e-5, rtol=1e-5)

    # And a bf16 path (sub-32-bit I/O branch in the kernel).
    xb = jax.random.normal(kx, (2, 4, 16, 16), dtype=jnp.float32).astype(jnp.bfloat16)
    outb = jax.block_until_ready(frn_tlu(xb, gamma, beta, tau, eps))
    refb = frn_tlu_ref(xb.astype(jnp.float32), gamma, beta, tau, eps)
    assert jnp.allclose(outb.astype(jnp.float32), refb, atol=3e-2, rtol=3e-2)

    print("KERNEL_OK")
</pallas_src>

<mosaic_0001>
module attributes {stable_mosaic.version = 11 : i64} {
  func.func @frn_tlu_kernel(%arg0: i32, %arg1: memref<1xf32, #tpu.memory_space<smem>>, %arg2: memref<8x256xf32, #tpu.memory_space<vmem>>, %arg3: memref<8x1xf32, #tpu.memory_space<vmem>>, %arg4: memref<8x1xf32, #tpu.memory_space<vmem>>, %arg5: memref<8x1xf32, #tpu.memory_space<vmem>>, %arg6: memref<8x256xf32, #tpu.memory_space<vmem>>) attributes {dimension_semantics = [#tpu.dimension_semantics<parallel>], iteration_bounds = array<i64: 1>, scalar_prefetch = 0 : i64, scratch_operands = 0 : i64, tpu.core_type = #tpu.core_type<tc>, window_params = [{transform_indices = @transform_0, window_bounds = array<i64: 1>}, {transform_indices = @transform_1, window_bounds = array<i64: 8, 256>}, {transform_indices = @transform_2, window_bounds = array<i64: 8, 1>}, {transform_indices = @transform_3, window_bounds = array<i64: 8, 1>}, {transform_indices = @transform_4, window_bounds = array<i64: 8, 1>}, {transform_indices = @transform_5, window_bounds = array<i64: 8, 256>}]} {
    %c0 = arith.constant 0 : index
    %c0_0 = arith.constant 0 : index
    %0 = vector.load %arg2[%c0, %c0_0] : memref<8x256xf32, #tpu.memory_space<vmem>>, vector<8x256xf32>
    %1 = arith.mulf %0, %0 : vector<8x256xf32>
    %cst = arith.constant dense<0.000000e+00> : vector<8xf32>
    %2 = vector.multi_reduction <add>, %1, %cst [1] : vector<8x256xf32> to vector<8xf32>
    %3 = vector.shape_cast %2 : vector<8xf32> to vector<8x1xf32>
    %cst_1 = arith.constant 3.906250e-03 : f32
    %4 = vector.broadcast %cst_1 : f32 to vector<8x1xf32>
    %5 = arith.mulf %3, %4 : vector<8x1xf32>
    %c0_2 = arith.constant 0 : index
    %6 = memref.load %arg1[%c0_2] : memref<1xf32, #tpu.memory_space<smem>>
    %7 = math.absf %6 : f32
    %8 = vector.broadcast %7 : f32 to vector<8x1xf32>
    %9 = arith.addf %5, %8 : vector<8x1xf32>
    %10 = math.rsqrt %9 : vector<8x1xf32>
    %c0_3 = arith.constant 0 : index
    %c0_4 = arith.constant 0 : index
    %11 = vector.load %arg3[%c0_3, %c0_4] : memref<8x1xf32, #tpu.memory_space<vmem>>, vector<8x1xf32>
    %c0_5 = arith.constant 0 : index
    %c0_6 = arith.constant 0 : index
    %12 = vector.load %arg4[%c0_5, %c0_6] : memref<8x1xf32, #tpu.memory_space<vmem>>, vector<8x1xf32>
    %c0_7 = arith.constant 0 : index
    %c0_8 = arith.constant 0 : index
    %13 = vector.load %arg5[%c0_7, %c0_8] : memref<8x1xf32, #tpu.memory_space<vmem>>, vector<8x1xf32>
    %14 = vector.broadcast %10 : vector<8x1xf32> to vector<8x256xf32>
    %15 = arith.mulf %0, %14 : vector<8x256xf32>
    %16 = vector.broadcast %11 : vector<8x1xf32> to vector<8x256xf32>
    %17 = arith.mulf %16, %15 : vector<8x256xf32>
    %18 = vector.broadcast %12 : vector<8x1xf32> to vector<8x256xf32>
    %19 = arith.addf %17, %18 : vector<8x256xf32>
    %20 = vector.broadcast %13 : vector<8x1xf32> to vector<8x256xf32>
    %21 = arith.maximumf %19, %20 : vector<8x256xf32>
    %c0_9 = arith.constant 0 : index
    %c0_10 = arith.constant 0 : index
    %22 = vector.load %arg6[%c0_9, %c0_10] : memref<8x256xf32, #tpu.memory_space<vmem>>, vector<8x256xf32>
    tpu.vector_store %arg6[%c0_9, %c0_10], %21 {strides = array<i32>} : memref<8x256xf32, #tpu.memory_space<vmem>>, vector<8x256xf32>,
    return
  }
  func.func @transform_0(%arg0: i32) -> i32 {
    %c0_i32 = arith.constant 0 : i32
    %c0_i32_0 = arith.constant 0 : i32
    return %c0_i32 : i32
  }
  func.func @transform_1(%arg0: i32) -> (i32, i32) {
    %c0_i32 = arith.constant 0 : i32
    %c0_i32_0 = arith.constant 0 : i32
    return %arg0, %c0_i32 : i32, i32
  }
  func.func @transform_2(%arg0: i32) -> (i32, i32) {
    %c0_i32 = arith.constant 0 : i32
    %c0_i32_0 = arith.constant 0 : i32
    return %arg0, %c0_i32 : i32, i32
  }
  func.func @transform_3(%arg0: i32) -> (i32, i32) {
    %c0_i32 = arith.constant 0 : i32
    %c0_i32_0 = arith.constant 0 : i32
    return %arg0, %c0_i32 : i32, i32
  }
  func.func @transform_4(%arg0: i32) -> (i32, i32) {
    %c0_i32 = arith.constant 0 : i32
    %c0_i32_0 = arith.constant 0 : i32
    return %arg0, %c0_i32 : i32, i32
  }
  func.func @transform_5(%arg0: i32) -> (i32, i32) {
    %c0_i32 = arith.constant 0 : i32
    %c0_i32_0 = arith.constant 0 : i32
    return %arg0, %c0_i32 : i32, i32
  }
}

</mosaic_0001>

<bundles_post_ra>
// kernel: tpu_custom_call.1
= control target key start
LH: loop header
LB: loop body
LE: loop exit
PB: predicated region body
PF: predicated region fallthrough
CT: control target
= control target key end

     0   :  { %v105_v5 = vmov 0   ;;  %s158_s0 = inlined_call_operand.<no memory space> [shape: f32[1], index: 0, kind: input, shape index: {}]   ;;  %s159_s1 = inlined_call_operand.vmem [shape: f32[8,256], index: 1, kind: input, shape index: {}]   ;;  %s160_s2 = inlined_call_operand.vmem [shape: f32[8,1], index: 2, kind: input, shape index: {}]   ;;  %s161_s3 = inlined_call_operand.vmem [shape: f32[8,1], index: 3, kind: input, shape index: {}]   ;;  %s162_s4 = inlined_call_operand.vmem [shape: f32[8,1], index: 4, kind: input, shape index: {}]   ;;  %s163_s5 = inlined_call_operand.hbm [shape: f32[8,256], index: 5, kind: output, shape index: {}]  }
   0x1   :  { %v22_v0 = vld [vmem:[%s159_s1] sm:$0xff]  ;;  %v23_v1 = vld [vmem:[%s159_s1 + $0x8] sm:$0xff]  ;;  %80 = vset.pattern.permute.xlu1 %v105_v5  ;;  %79 = vset.pattern.permute.xlu0 %v105_v5 }
   0x2   :  { %v36_v2 = vld [vmem:[%s161_s3] sm:$0xff]  ;;  %v24_v3 = vmul.f32 %v22_v0, %v22_v0  ;;  %v25_v4 = vmul.f32 %v23_v1, %v23_v1 }
   0x3   :  { %11 = vsyncpa [#allocation4], 0  ;;  %49 = vperm.xlu1 %80, %v36_v2   ;;  %v37_v7 = vld [vmem:[%s162_s4] sm:$0xff]  ;;  %s31_s28 = sand.u32 2147483647, %s158_s0  ;;  %s106_s4 = smov [#allocation3]  }
   0x4   :  { %v26_v6 = vadd.f32 %v25_v4, %v24_v3  ;;  %v35_v8 = vld [vmem:[%s160_s2] sm:$0xff]  ;;  %v32_v9 = vstv %s31_s28  ;;  %s69_s29 = sshll.u32 %s106_s4, 4  ;;  %s70_s29 = int_to_ptr.vmem [resolvable:$true] %s69_s29 }
   0x5   :  { %s83_s0 = scalar_lea.vmem %s70_s29, 256  ;;  %p88_p1 = scmp.lt.s32.totalorder %s70_s29, %s70_s29 }
   0x6   :  { %27 = vadd.xlane.f32.xlu0 %v26_v6  ;;  %p84_p0 = scmp.ne.s32.totalorder %s70_s29, %s83_s0  ;;  %p89_p2 = scmp.lt.s32.totalorder %s83_s0, %s83_s0 }
   0x7   :  { %56 = vperm.xlu1 %80, %v37_v7  }
   0x8   :  { %p90_p3 = por %p89_p2, %p88_p1 }
   0xa   :  { %p91_p4 = pnand %p90_p3, %p84_p0 }
  0x1c   :  { %42 = vperm.xlu0 %79, %v35_v8  }
  0x7e   :  { %v50_v14 = vpop.permute.xlu1 %49 }
  0x82   :  { %v57_v22 = vpop.permute.xlu1 %56 }
  0x8f   :  { %v28_v10 = vpop.xlane.xlu0 %27 }
  0x90   :  { %v29_v11 = vmul.f32 0.00390625, %v28_v10 }
  0x92   :  { %v33_v12 = vadd.f32 %v32_v9, %v29_v11 }
  0x94   :  { %81 = vrsqrt.f32 %v33_v12 }
  0x97   :  { %v43_v15 = vpop.permute.xlu0 %42 }
  0xa1   :  { %v82_v13 = vpop.eup %81 }
  0xa2   :  { %v38_v16 = vmul.f32 %v82_v13, %v22_v0  ;;  %v39_v17 = vmul.f32 %v82_v13, %v23_v1 }
  0xa4   :  { %v45_v18 = vmul.f32 %v43_v15, %v38_v16  ;;  %v46_v19 = vmul.f32 %v43_v15, %v39_v17 }
  0xa6   :  { %v52_v20 = vadd.f32 %v50_v14, %v45_v18  ;;  %v53_v21 = vadd.f32 %v50_v14, %v46_v19 }
  0xa8   :  { %v59_v23 = vmax.f32 %v52_v20, %v57_v22  ;;  %v60_v24 = vmax.f32 %v53_v21, %v57_v22 }
  0xaa   :  { %61 = vst [vmem:[#allocation3] sm:$0xff] %v59_v23  ;;  %62 = vst [vmem:[#allocation3 + $0x8] sm:$0xff] %v60_v24 }
  0xab   :  { %94 = shalt.err (!%p91_p4)
}
  0xac   :  { %72 = dma.vmem_to_hbm [thread:$0]  %s70_s29, 256, %s163_s5, [#allocation4]  }
  0xad   :  { %103 = dma.done.wait [#allocation4], 256  }
  0xae   :  { %104 = vsyncadd [#allocation4], 4294967040 }
  0xaf   :  { %76 = vsyncpa [#allocation4], 1 }

</bundles_post_ra>
